<compile_context>
chip_gen: v5e
topology: v5e:2x2
jax: 0.10.0
libtpu: 0.0.40
codegen_flags: <defaults>
</compile_context>

<pallas_src>
import jax
import jax.numpy as jnp
from jax.experimental import pallas as pl
from jax.experimental.pallas import tpu as pltpu


# --------------------------------------------------------------------------------------
# VMEM budget (queried once at import; generation-aware: v7x has 64 MiB/TC, v5e/v6e 128)
# --------------------------------------------------------------------------------------
def _query_vmem_capacity():
    try:
        return int(getattr(pltpu.get_tpu_info(), "vmem_capacity_bytes", 128 << 20))
    except Exception:
        return 128 << 20


_VMEM_CAPACITY = _query_vmem_capacity()
# Pipeline budget (streamed blocks + scratch): conservative on 64-MiB chips (v7x-class),
# roomier on 128-MiB chips (v5e/v6e).
_VMEM_BUDGET = (26 << 20) if _VMEM_CAPACITY <= (64 << 20) else (56 << 20)
_VMEM_LIMIT = _VMEM_BUDGET + (4 << 20)


def _choose_time_block(T, B, E, H, in_bytes, out_bytes):
    """Pick TT so the pipeline has >=~4 stages, TT<=128, and the VMEM budget holds."""
    # Per-timestep VMEM: double-buffered embedded-in + output-out blocks + f32 gi scratch.
    per_t = B * (2 * E * in_bytes + 2 * H * out_bytes + 3 * H * 4)
    cap = max(1, _VMEM_BUDGET // max(per_t, 1))
    tt = min(T, 128, cap)
    if T >= 4:
        tt = min(tt, (T + 3) // 4)  # keep n_blk >= 4 so DMA/compute actually overlap
    return max(1, tt)


# --------------------------------------------------------------------------------------
# Pallas kernel: TT GRU timesteps per grid iteration.
#   - block input projection (one big MXU matmul) at the top of each grid step
#   - hidden state carried in VMEM scratch across the sequential ("arbitrary") grid
# --------------------------------------------------------------------------------------
def gru_seq_kernel(emb_ref, lens_ref, wih_ref, bih_ref, whh_ref, bhn_ref,
                   out_ref, hfin_ref, gi_scr, h_scr):
    blk = pl.program_id(0)
    n_blk = pl.num_programs(0)
    TT, B, E = emb_ref.shape
    H = h_scr.shape[1]

    @pl.when(blk == 0)
    def _():
        # hidden=None in the PyTorch forward -> zero initial hidden state
        h_scr[...] = jnp.zeros_like(h_scr)

    # ---- Block-level input projection (off the sequential critical path) ----
    # gi = x @ W_ih^T + (b_ih + [b_hr, b_hz, 0])   for all TT timesteps at once.
    emb = emb_ref[...].reshape(TT * B, E)                       # bf16
    gi_blk = jnp.dot(emb, wih_ref[...],
                     preferred_element_type=jnp.float32)        # (TT*B, 3H) f32
    gi_scr[...] = (gi_blk + bih_ref[...]).reshape(TT, B, 3 * H)

    # Residents, loaded / broadcast once per grid step (hoisted out of the time loop).
    lens_v = lens_ref[...]                                      # (B, 1) int32
    whh = whh_ref[...]                                          # (H, 3H) bf16
    bhn_b = jnp.broadcast_to(bhn_ref[...], (B, H))              # (B, H) f32, hoisted
    t0 = blk * TT                                               # global time offset

    def step(s, h):
        gi = gi_scr[s]                                          # (B, 3H) f32
        # Recurrent projection: the only matmul on the sequential critical path.
        gh = jnp.dot(h.astype(whh.dtype), whh,
                     preferred_element_type=jnp.float32)        # (B, 3H) f32

        # PyTorch GRU gate order is (r, z, n); b_hr/b_hz already folded into gi.
        i_r, i_z, i_n = gi[:, 0:H], gi[:, H:2 * H], gi[:, 2 * H:3 * H]
        h_r, h_z, h_n = gh[:, 0:H], gh[:, H:2 * H], gh[:, 2 * H:3 * H]
        r = jax.nn.sigmoid(i_r + h_r)
        z = jax.nn.sigmoid(i_z + h_z)
        n = jnp.tanh(i_n + r * (h_n + bhn_b))   # b_hn must stay inside r*(...)
        h_new = (1.0 - z) * n + z * h

        # packed-sequence semantics: freeze h and zero the output once t >= len[b]
        valid = (t0 + s) < lens_v                               # (B, 1) bool
        out_ref[s] = jnp.where(valid, h_new, 0.0).astype(out_ref.dtype)
        return jnp.where(valid, h_new, h)

    # Partial unroll: full unroll only for small TT (avoids vreg spills / code bloat).
    h_last = jax.lax.fori_loop(0, TT, step, h_scr[...],
                               unroll=(TT if TT <= 8 else 8))
    h_scr[...] = h_last

    # Final hidden written once (already frozen at each sequence's last valid step).
    @pl.when(blk == n_blk - 1)
    def _():
        hfin_ref[0] = h_scr[...].astype(hfin_ref.dtype)


def gru_pallas(embedded, input_lens, w_ih_t, b_ih_folded, w_hh_t, b_hn,
               *, time_block=None, compute_dtype=jnp.bfloat16,
               out_dtype=jnp.float32):
    """embedded: [T,B,E] f32, input_lens: [B] int, w_ih_t: [E,3H], w_hh_t: [H,3H],
    b_ih_folded: [1,3H] (= b_ih with b_hr/b_hz folded in), b_hn: [1,H]."""
    T, B, E = embedded.shape
    H = w_hh_t.shape[0]
    in_bytes = jnp.dtype(compute_dtype).itemsize
    out_bytes = jnp.dtype(out_dtype).itemsize

    tt = time_block if time_block is not None else _choose_time_block(
        T, B, E, H, in_bytes, out_bytes)
    n_blk = (T + tt - 1) // tt
    T_pad = n_blk * tt
    if T_pad != T:
        # Zero-padded steps have t >= len[b] for every b, so the mask neutralizes them.
        embedded = jnp.pad(embedded, ((0, T_pad - T), (0, 0), (0, 0)))

    emb = embedded.astype(compute_dtype)
    wih = w_ih_t.astype(compute_dtype)
    whh = w_hh_t.astype(compute_dtype)
    lens2d = input_lens.reshape(B, 1).astype(jnp.int32)

    grid_spec = pltpu.PrefetchScalarGridSpec(
        num_scalar_prefetch=0,
        grid=(n_blk,),
        in_specs=[
            # TODO(synk): for v6e at large T, consider pipeline_mode=pl.Buffered(3) here.
            pl.BlockSpec((tt, B, E), lambda i: (i, 0, 0)),        # embedded (time-blocked)
            # TODO(synk): lens could live in SMEM via scalar prefetch instead.
            pl.BlockSpec((B, 1), lambda i: (0, 0)),               # lengths (resident)
            pl.BlockSpec((E, 3 * H), lambda i: (0, 0)),           # W_ih^T (resident)
            pl.BlockSpec((1, 3 * H), lambda i: (0, 0)),           # b_ih folded (resident)
            pl.BlockSpec((H, 3 * H), lambda i: (0, 0)),           # W_hh^T (resident)
            pl.BlockSpec((1, H), lambda i: (0, 0)),               # b_hn (resident)
        ],
        out_specs=[
            pl.BlockSpec((tt, B, H), lambda i: (i, 0, 0)),        # outputs block
            pl.BlockSpec((1, B, H), lambda i: (0, 0, 0)),         # final hidden (resident)
        ],
        scratch_shapes=[
            pltpu.VMEM((tt, B, 3 * H), jnp.float32),              # block input projection
            pltpu.VMEM((B, H), jnp.float32),                      # carried hidden state
        ],
    )

    outputs, hidden = pl.pallas_call(
        gru_seq_kernel,
        grid_spec=grid_spec,
        out_shape=(
            # TODO(synk): emit bf16 outputs if the downstream decoder tolerates it
            # (halves the T*B*H writeback traffic).
            jax.ShapeDtypeStruct((T_pad, B, H), out_dtype),
            jax.ShapeDtypeStruct((1, B, H), jnp.float32),
        ),
        compiler_params=pltpu.CompilerParams(
            # Time recurrence must run sequentially.
            # TODO(synk): on v7x (2 TCs) with B >= 16, add a leading "parallel" batch
            # grid axis so the second TensorCore gets work.
            dimension_semantics=("arbitrary",),
            vmem_limit_bytes=int(_VMEM_LIMIT),
        ),
    )(emb, lens2d, wih, b_ih_folded.astype(jnp.float32), whh,
      b_hn.astype(jnp.float32))

    if T_pad != T:
        outputs = outputs[:T]
    return outputs, hidden


# --------------------------------------------------------------------------------------
# EncoderRNN forward (cell_type='gru', depth=1; dropout unused for a single layer)
# --------------------------------------------------------------------------------------
def encoder_rnn_forward(params, input_seqs, input_lens, max_len=None, time_block=None):
    """input_seqs: [T, B] int32, input_lens: [B] int32.
    Returns (outputs [T,B,H] zero-padded past each length, hidden [1,B,H])."""
    H = params["w_hh_t"].shape[0]

    # Embedding lookup (glue): padding_idx=3 row already zeroed in the table.
    embedded = params["embedding"][input_seqs]                    # [T, B, E]

    # Fold the r/z halves of b_hh into b_ih (b_hn must stay inside r*(W_hn h + b_hn)).
    b_ih, b_hh = params["b_ih"], params["b_hh"]
    b_ih_folded = jnp.concatenate(
        [b_ih[:, :2 * H] + b_hh[:, :2 * H], b_ih[:, 2 * H:]], axis=1)
    b_hn = b_hh[:, 2 * H:]

    outputs, hidden = gru_pallas(embedded, input_lens, params["w_ih_t"], b_ih_folded,
                                 params["w_hh_t"], b_hn, time_block=time_block)

    if max_len is not None:                  # static slice; never int(jnp.max(...))
        outputs = outputs[:max_len]
    return outputs, hidden


def init_params(key, vocab_size, embed_size, hidden_size):
    k1, k2, k3, k4, k5 = jax.random.split(key, 5)
    scale_e = 1.0 / jnp.sqrt(embed_size)
    scale_h = 1.0 / jnp.sqrt(hidden_size)
    embedding = jax.random.normal(k1, (vocab_size, embed_size), jnp.float32) * scale_e
    embedding = embedding.at[3].set(0.0)                          # padding_idx = 3
    # GRU weights stored pre-transposed: x @ W_ih^T -> W_ih^T has shape [E, 3H].
    # TODO(synk): orthogonal init of hh blocks (init_gru) not reproduced; shapes match.
    w_ih_t = jax.random.uniform(k2, (embed_size, 3 * hidden_size), jnp.float32,
                                -scale_h, scale_h)
    w_hh_t = jax.random.uniform(k3, (hidden_size, 3 * hidden_size), jnp.float32,
                                -scale_h, scale_h)
    b_ih = jax.random.uniform(k4, (1, 3 * hidden_size), jnp.float32, -scale_h, scale_h)
    b_hh = jax.random.uniform(k5, (1, 3 * hidden_size), jnp.float32, -scale_h, scale_h)
    return dict(embedding=embedding, w_ih_t=w_ih_t, w_hh_t=w_hh_t, b_ih=b_ih, b_hh=b_hh)


# --------------------------------------------------------------------------------------
# Pure-JAX reference (same GRU formula; mirrors the kernel's bf16-matmul / f32-gate
# precision so the correctness check stays tight).
# --------------------------------------------------------------------------------------
def gru_reference(embedded, input_lens, w_ih_t, w_hh_t, b_ih, b_hh,
                  compute_dtype=jnp.bfloat16):
    T, B, _ = embedded.shape
    H = w_hh_t.shape[0]
    mask = (jnp.arange(T)[:, None] < input_lens[None, :]).astype(jnp.float32)[..., None]
    x_c = embedded.astype(compute_dtype)
    wih = w_ih_t.astype(compute_dtype)
    whh = w_hh_t.astype(compute_dtype)

    def step(h, xm):
        x, m = xm
        gi = jnp.dot(x, wih, preferred_element_type=jnp.float32) + b_ih
        gh = jnp.dot(h.astype(compute_dtype), whh,
                     preferred_element_type=jnp.float32) + b_hh
        i_r, i_z, i_n = gi[:, :H], gi[:, H:2 * H], gi[:, 2 * H:]
        h_r, h_z, h_n = gh[:, :H], gh[:, H:2 * H], gh[:, 2 * H:]
        r = jax.nn.sigmoid(i_r + h_r)
        z = jax.nn.sigmoid(i_z + h_z)
        n = jnp.tanh(i_n + r * h_n)
        h_new = (1.0 - z) * n + z * h
        h_carry = m * h_new + (1.0 - m) * h
        return h_carry, m * h_new

    h0 = jnp.zeros((B, H), jnp.float32)
    h_fin, outs = jax.lax.scan(step, h0, (x_c, mask))
    return outs, h_fin[None]


if __name__ == "__main__":
    # Small, tile-friendly shapes: T=8, B=8, vocab=32, E=128, H=128
    T, B, V, E, H = 8, 8, 32, 128, 128

    key = jax.random.PRNGKey(0)
    kp, ks = jax.random.split(key)
    params = init_params(kp, V, E, H)

    input_seqs = jax.random.randint(ks, (T, B), 0, V, dtype=jnp.int32)
    # Variable lengths, with at least one full-length sequence (so max_len == T).
    input_lens = jnp.array([T, 5, 3, 7, 2, 6, 4, 8], dtype=jnp.int32)

    fwd = jax.jit(encoder_rnn_forward)          # no host sync inside -> jit-safe
    outputs, hidden = fwd(params, input_seqs, input_lens)
    outputs = jax.block_until_ready(outputs)
    hidden = jax.block_until_ready(hidden)

    # Cross-check against the pure-JAX reference (same GRU formula, per-step input
    # projection with un-folded biases; mixed precision mirrored).
    embedded = params["embedding"][input_seqs]
    ref_out, ref_hid = gru_reference(embedded, input_lens, params["w_ih_t"],
                                     params["w_hh_t"], params["b_ih"], params["b_hh"])
    assert outputs.shape == (T, B, H) and hidden.shape == (1, B, H)
    assert jnp.allclose(outputs, ref_out, atol=2e-3, rtol=2e-3)
    assert jnp.allclose(hidden, ref_hid, atol=2e-3, rtol=2e-3)

    print("KERNEL_OK")
</pallas_src>

<mosaic_0001>
module attributes {stable_mosaic.version = 11 : i64} {
  func.func @gru_seq_kernel(%arg0: i32, %arg1: memref<2x8x128xbf16, #tpu.memory_space<vmem>>, %arg2: memref<8x1xi32, #tpu.memory_space<vmem>>, %arg3: memref<128x384xbf16, #tpu.memory_space<vmem>>, %arg4: memref<1x384xf32, #tpu.memory_space<vmem>>, %arg5: memref<128x384xbf16, #tpu.memory_space<vmem>>, %arg6: memref<1x128xf32, #tpu.memory_space<vmem>>, %arg7: memref<2x8x128xf32, #tpu.memory_space<vmem>>, %arg8: memref<1x8x128xf32, #tpu.memory_space<vmem>>, %arg9: memref<2x8x384xf32, #tpu.memory_space<vmem>>, %arg10: memref<8x128xf32, #tpu.memory_space<vmem>>) attributes {dimension_semantics = [#tpu.dimension_semantics<arbitrary>], iteration_bounds = array<i64: 4>, scalar_prefetch = 0 : i64, scratch_operands = 2 : i64, tpu.core_type = #tpu.core_type<tc>, window_params = [{transform_indices = @transform_0, window_bounds = array<i64: 2, 8, 128>}, {pipeline_mode = #tpu.pipeline_mode<synchronous>, transform_indices = @transform_1, window_bounds = array<i64: 8, 1>}, {pipeline_mode = #tpu.pipeline_mode<synchronous>, transform_indices = @transform_2, window_bounds = array<i64: 128, 384>}, {pipeline_mode = #tpu.pipeline_mode<synchronous>, transform_indices = @transform_3, window_bounds = array<i64: 1, 384>}, {pipeline_mode = #tpu.pipeline_mode<synchronous>, transform_indices = @transform_4, window_bounds = array<i64: 128, 384>}, {pipeline_mode = #tpu.pipeline_mode<synchronous>, transform_indices = @transform_5, window_bounds = array<i64: 1, 128>}, {transform_indices = @transform_6, window_bounds = array<i64: 2, 8, 128>}, {pipeline_mode = #tpu.pipeline_mode<synchronous>, transform_indices = @transform_7, window_bounds = array<i64: 1, 8, 128>}]} {
    %c0_i32 = arith.constant 0 : i32
    %0 = arith.cmpi eq, %arg0, %c0_i32 : i32
    %1 = arith.extui %0 : i1 to i32
    %c0_i32_0 = arith.constant 0 : i32
    %2 = arith.cmpi ne, %1, %c0_i32_0 : i32
    scf.if %2 {
      %cst_41 = arith.constant 0.000000e+00 : f32
      %115 = vector.broadcast %cst_41 : f32 to vector<8x128xf32>
      %c0_42 = arith.constant 0 : index
      %c0_43 = arith.constant 0 : index
      %116 = vector.load %arg10[%c0_42, %c0_43] : memref<8x128xf32, #tpu.memory_space<vmem>>, vector<8x128xf32>
      tpu.vector_store %arg10[%c0_42, %c0_43], %115 {strides = array<i32>} : memref<8x128xf32, #tpu.memory_space<vmem>>, vector<8x128xf32>,
    } else {
    }
    %c0 = arith.constant 0 : index
    %c0_1 = arith.constant 0 : index
    %c0_2 = arith.constant 0 : index
    %3 = vector.load %arg1[%c0, %c0_1, %c0_2] : memref<2x8x128xbf16, #tpu.memory_space<vmem>>, vector<2x8x128xbf16>
    %4 = vector.shape_cast %3 : vector<2x8x128xbf16> to vector<16x128xbf16>
    %c0_3 = arith.constant 0 : index
    %c0_4 = arith.constant 0 : index
    %5 = vector.load %arg3[%c0_3, %c0_4] : memref<128x384xbf16, #tpu.memory_space<vmem>>, vector<128x384xbf16>
    %cst = arith.constant dense<0.000000e+00> : vector<16x384xf32>
    %6 = tpu.matmul %4, %5, %cst {dimension_numbers = #tpu.dot_dimension_numbers<[1], [0], [0], [1], [0, 0, 1, 1], [], []>} : vector<16x128xbf16>, vector<128x384xbf16>, vector<16x384xf32> -> vector<16x384xf32>
    %c0_5 = arith.constant 0 : index
    %c0_6 = arith.constant 0 : index
    %7 = vector.load %arg4[%c0_5, %c0_6] : memref<1x384xf32, #tpu.memory_space<vmem>>, vector<1x384xf32>
    %8 = vector.broadcast %7 : vector<1x384xf32> to vector<16x384xf32>
    %9 = arith.addf %6, %8 : vector<16x384xf32>
    %10 = vector.shape_cast %9 : vector<16x384xf32> to vector<2x8x384xf32>
    %c0_7 = arith.constant 0 : index
    %c0_8 = arith.constant 0 : index
    %c0_9 = arith.constant 0 : index
    %11 = vector.load %arg9[%c0_7, %c0_8, %c0_9] : memref<2x8x384xf32, #tpu.memory_space<vmem>>, vector<2x8x384xf32>
    tpu.vector_store %arg9[%c0_7, %c0_8, %c0_9], %10 {strides = array<i32>} : memref<2x8x384xf32, #tpu.memory_space<vmem>>, vector<2x8x384xf32>,
    %c0_10 = arith.constant 0 : index
    %c0_11 = arith.constant 0 : index
    %12 = vector.load %arg2[%c0_10, %c0_11] : memref<8x1xi32, #tpu.memory_space<vmem>>, vector<8x1xi32>
    %c0_12 = arith.constant 0 : index
    %c0_13 = arith.constant 0 : index
    %13 = vector.load %arg5[%c0_12, %c0_13] : memref<128x384xbf16, #tpu.memory_space<vmem>>, vector<128x384xbf16>
    %c0_14 = arith.constant 0 : index
    %c0_15 = arith.constant 0 : index
    %14 = vector.load %arg6[%c0_14, %c0_15] : memref<1x128xf32, #tpu.memory_space<vmem>>, vector<1x128xf32>
    %15 = vector.shape_cast %14 : vector<1x128xf32> to vector<1x128xf32>
    %16 = vector.broadcast %15 : vector<1x128xf32> to vector<8x128xf32>
    %c2_i32 = arith.constant 2 : i32
    %17 = arith.muli %arg0, %c2_i32 : i32
    %c0_16 = arith.constant 0 : index
    %c0_17 = arith.constant 0 : index
    %18 = vector.load %arg10[%c0_16, %c0_17] : memref<8x128xf32, #tpu.memory_space<vmem>>, vector<8x128xf32>
    %c0_i32_18 = arith.constant 0 : i32
    %19 = arith.index_cast %c0_i32_18 : i32 to index
    %c0_19 = arith.constant 0 : index
    %c0_20 = arith.constant 0 : index
    %20 = vector.load %arg9[%19, %c0_19, %c0_20] : memref<2x8x384xf32, #tpu.memory_space<vmem>>, vector<1x8x384xf32>
    %21 = vector.shape_cast %20 : vector<1x8x384xf32> to vector<8x384xf32>
    %22 = arith.truncf %18 : vector<8x128xf32> to vector<8x128xbf16>
    %cst_21 = arith.constant dense<0.000000e+00> : vector<8x384xf32>
    %23 = tpu.matmul %22, %13, %cst_21 {dimension_numbers = #tpu.dot_dimension_numbers<[1], [0], [0], [1], [0, 0, 1, 1], [], []>} : vector<8x128xbf16>, vector<128x384xbf16>, vector<8x384xf32> -> vector<8x384xf32>
    %24 = vector.extract_strided_slice %21 {offsets = [0, 0], sizes = [8, 128], strides = [1, 1]} : vector<8x384xf32> to vector<8x128xf32>
    %25 = vector.extract_strided_slice %21 {offsets = [0, 128], sizes = [8, 128], strides = [1, 1]} : vector<8x384xf32> to vector<8x128xf32>
    %26 = vector.extract_strided_slice %21 {offsets = [0, 256], sizes = [8, 128], strides = [1, 1]} : vector<8x384xf32> to vector<8x128xf32>
    %27 = vector.extract_strided_slice %23 {offsets = [0, 0], sizes = [8, 128], strides = [1, 1]} : vector<8x384xf32> to vector<8x128xf32>
    %28 = vector.extract_strided_slice %23 {offsets = [0, 128], sizes = [8, 128], strides = [1, 1]} : vector<8x384xf32> to vector<8x128xf32>
    %29 = vector.extract_strided_slice %23 {offsets = [0, 256], sizes = [8, 128], strides = [1, 1]} : vector<8x384xf32> to vector<8x128xf32>
    %30 = arith.addf %24, %27 : vector<8x128xf32>
    %31 = arith.negf %30 : vector<8x128xf32>
    %32 = math.exp %31 : vector<8x128xf32>
    %cst_22 = arith.constant 1.000000e+00 : f32
    %33 = vector.broadcast %cst_22 : f32 to vector<8x128xf32>
    %34 = arith.addf %33, %32 : vector<8x128xf32>
    %35 = arith.divf %33, %34 : vector<8x128xf32>
    %36 = arith.addf %25, %28 : vector<8x128xf32>
    %37 = arith.negf %36 : vector<8x128xf32>
    %38 = math.exp %37 : vector<8x128xf32>
    %cst_23 = arith.constant 1.000000e+00 : f32
    %39 = vector.broadcast %cst_23 : f32 to vector<8x128xf32>
    %40 = arith.addf %39, %38 : vector<8x128xf32>
    %41 = arith.divf %39, %40 : vector<8x128xf32>
    %42 = arith.addf %29, %16 : vector<8x128xf32>
    %43 = arith.mulf %35, %42 : vector<8x128xf32>
    %44 = arith.addf %26, %43 : vector<8x128xf32>
    %45 = math.tanh %44 : vector<8x128xf32>
    %cst_24 = arith.constant 1.000000e+00 : f32
    %46 = vector.broadcast %cst_24 : f32 to vector<8x128xf32>
    %47 = arith.subf %46, %41 : vector<8x128xf32>
    %48 = arith.mulf %47, %45 : vector<8x128xf32>
    %49 = arith.mulf %41, %18 : vector<8x128xf32>
    %50 = arith.addf %48, %49 : vector<8x128xf32>
    %51 = arith.addi %17, %c0_i32_18 : i32
    %52 = vector.broadcast %51 : i32 to vector<8x1xi32>
    %53 = arith.cmpi slt, %52, %12 : vector<8x1xi32>
    %cst_25 = arith.constant 0.000000e+00 : f32
    %54 = vector.shape_cast %53 : vector<8x1xi1> to vector<8x1xi1>
    %55 = vector.broadcast %54 : vector<8x1xi1> to vector<8x128xi1>
    %56 = vector.broadcast %cst_25 : f32 to vector<8x128xf32>
    %57 = arith.select %55, %50, %56 : vector<8x128xi1>, vector<8x128xf32>
    %58 = arith.index_cast %c0_i32_18 : i32 to index
    %c0_26 = arith.constant 0 : index
    %c0_27 = arith.constant 0 : index
    %59 = vector.load %arg7[%58, %c0_26, %c0_27] : memref<2x8x128xf32, #tpu.memory_space<vmem>>, vector<1x8x128xf32>
    %60 = vector.shape_cast %59 : vector<1x8x128xf32> to vector<8x128xf32>
    %61 = vector.shape_cast %57 : vector<8x128xf32> to vector<1x8x128xf32>
    tpu.vector_store %arg7[%58, %c0_26, %c0_27], %61 {strides = array<i32>} : memref<2x8x128xf32, #tpu.memory_space<vmem>>, vector<1x8x128xf32>,
    %62 = vector.shape_cast %53 : vector<8x1xi1> to vector<8x1xi1>
    %63 = vector.broadcast %62 : vector<8x1xi1> to vector<8x128xi1>
    %64 = arith.select %63, %50, %18 : vector<8x128xi1>, vector<8x128xf32>
    %c1_i32 = arith.constant 1 : i32
    %65 = arith.index_cast %c1_i32 : i32 to index
    %c0_28 = arith.constant 0 : index
    %c0_29 = arith.constant 0 : index
    %66 = vector.load %arg9[%65, %c0_28, %c0_29] : memref<2x8x384xf32, #tpu.memory_space<vmem>>, vector<1x8x384xf32>
    %67 = vector.shape_cast %66 : vector<1x8x384xf32> to vector<8x384xf32>
    %68 = arith.truncf %64 : vector<8x128xf32> to vector<8x128xbf16>
    %cst_30 = arith.constant dense<0.000000e+00> : vector<8x384xf32>
    %69 = tpu.matmul %68, %13, %cst_30 {dimension_numbers = #tpu.dot_dimension_numbers<[1], [0], [0], [1], [0, 0, 1, 1], [], []>} : vector<8x128xbf16>, vector<128x384xbf16>, vector<8x384xf32> -> vector<8x384xf32>
    %70 = vector.extract_strided_slice %67 {offsets = [0, 0], sizes = [8, 128], strides = [1, 1]} : vector<8x384xf32> to vector<8x128xf32>
    %71 = vector.extract_strided_slice %67 {offsets = [0, 128], sizes = [8, 128], strides = [1, 1]} : vector<8x384xf32> to vector<8x128xf32>
    %72 = vector.extract_strided_slice %67 {offsets = [0, 256], sizes = [8, 128], strides = [1, 1]} : vector<8x384xf32> to vector<8x128xf32>
    %73 = vector.extract_strided_slice %69 {offsets = [0, 0], sizes = [8, 128], strides = [1, 1]} : vector<8x384xf32> to vector<8x128xf32>
    %74 = vector.extract_strided_slice %69 {offsets = [0, 128], sizes = [8, 128], strides = [1, 1]} : vector<8x384xf32> to vector<8x128xf32>
    %75 = vector.extract_strided_slice %69 {offsets = [0, 256], sizes = [8, 128], strides = [1, 1]} : vector<8x384xf32> to vector<8x128xf32>
    %76 = arith.addf %70, %73 : vector<8x128xf32>
    %77 = arith.negf %76 : vector<8x128xf32>
    %78 = math.exp %77 : vector<8x128xf32>
    %cst_31 = arith.constant 1.000000e+00 : f32
    %79 = vector.broadcast %cst_31 : f32 to vector<8x128xf32>
    %80 = arith.addf %79, %78 : vector<8x128xf32>
    %81 = arith.divf %79, %80 : vector<8x128xf32>
    %82 = arith.addf %71, %74 : vector<8x128xf32>
    %83 = arith.negf %82 : vector<8x128xf32>
    %84 = math.exp %83 : vector<8x128xf32>
    %cst_32 = arith.constant 1.000000e+00 : f32
    %85 = vector.broadcast %cst_32 : f32 to vector<8x128xf32>
    %86 = arith.addf %85, %84 : vector<8x128xf32>
    %87 = arith.divf %85, %86 : vector<8x128xf32>
    %88 = arith.addf %75, %16 : vector<8x128xf32>
    %89 = arith.mulf %81, %88 : vector<8x128xf32>
    %90 = arith.addf %72, %89 : vector<8x128xf32>
    %91 = math.tanh %90 : vector<8x128xf32>
    %cst_33 = arith.constant 1.000000e+00 : f32
    %92 = vector.broadcast %cst_33 : f32 to vector<8x128xf32>
    %93 = arith.subf %92, %87 : vector<8x128xf32>
    %94 = arith.mulf %93, %91 : vector<8x128xf32>
    %95 = arith.mulf %87, %64 : vector<8x128xf32>
    %96 = arith.addf %94, %95 : vector<8x128xf32>
    %97 = arith.addi %17, %c1_i32 : i32
    %98 = vector.broadcast %97 : i32 to vector<8x1xi32>
    %99 = arith.cmpi slt, %98, %12 : vector<8x1xi32>
    %cst_34 = arith.constant 0.000000e+00 : f32
    %100 = vector.shape_cast %99 : vector<8x1xi1> to vector<8x1xi1>
    %101 = vector.broadcast %100 : vector<8x1xi1> to vector<8x128xi1>
    %102 = vector.broadcast %cst_34 : f32 to vector<8x128xf32>
    %103 = arith.select %101, %96, %102 : vector<8x128xi1>, vector<8x128xf32>
    %104 = arith.index_cast %c1_i32 : i32 to index
    %c0_35 = arith.constant 0 : index
    %c0_36 = arith.constant 0 : index
    %105 = vector.load %arg7[%104, %c0_35, %c0_36] : memref<2x8x128xf32, #tpu.memory_space<vmem>>, vector<1x8x128xf32>
    %106 = vector.shape_cast %105 : vector<1x8x128xf32> to vector<8x128xf32>
    %107 = vector.shape_cast %103 : vector<8x128xf32> to vector<1x8x128xf32>
    tpu.vector_store %arg7[%104, %c0_35, %c0_36], %107 {strides = array<i32>} : memref<2x8x128xf32, #tpu.memory_space<vmem>>, vector<1x8x128xf32>,
    %108 = vector.shape_cast %99 : vector<8x1xi1> to vector<8x1xi1>
    %109 = vector.broadcast %108 : vector<8x1xi1> to vector<8x128xi1>
    %110 = arith.select %109, %96, %64 : vector<8x128xi1>, vector<8x128xf32>
    %c2_i32_37 = arith.constant 2 : i32
    %c0_38 = arith.constant 0 : index
    %c0_39 = arith.constant 0 : index
    %111 = vector.load %arg10[%c0_38, %c0_39] : memref<8x128xf32, #tpu.memory_space<vmem>>, vector<8x128xf32>
    tpu.vector_store %arg10[%c0_38, %c0_39], %110 {strides = array<i32>} : memref<8x128xf32, #tpu.memory_space<vmem>>, vector<8x128xf32>,
    %c3_i32 = arith.constant 3 : i32
    %112 = arith.cmpi eq, %arg0, %c3_i32 : i32
    %113 = arith.extui %112 : i1 to i32
    %c0_i32_40 = arith.constant 0 : i32
    %114 = arith.cmpi ne, %113, %c0_i32_40 : i32
    scf.if %114 {
      %c0_41 = arith.constant 0 : index
      %c0_42 = arith.constant 0 : index
      %115 = vector.load %arg10[%c0_41, %c0_42] : memref<8x128xf32, #tpu.memory_space<vmem>>, vector<8x128xf32>
      %c0_43 = arith.constant 0 : index
      %c0_44 = arith.constant 0 : index
      %c0_45 = arith.constant 0 : index
      %116 = vector.load %arg8[%c0_43, %c0_44, %c0_45] : memref<1x8x128xf32, #tpu.memory_space<vmem>>, vector<1x8x128xf32>
      %117 = vector.shape_cast %116 : vector<1x8x128xf32> to vector<8x128xf32>
      %118 = vector.shape_cast %115 : vector<8x128xf32> to vector<1x8x128xf32>
      tpu.vector_store %arg8[%c0_43, %c0_44, %c0_45], %118 {strides = array<i32>} : memref<1x8x128xf32, #tpu.memory_space<vmem>>, vector<1x8x128xf32>,
    } else {
    }
    return
  }
  func.func @transform_0(%arg0: i32) -> (i32, i32, i32) {
    %c0_i32 = arith.constant 0 : i32
    %c0_i32_0 = arith.constant 0 : i32
    %c0_i32_1 = arith.constant 0 : i32
    return %arg0, %c0_i32, %c0_i32_0 : i32, i32, i32
  }
  func.func @transform_1(%arg0: i32) -> (i32, i32) {
    %c0_i32 = arith.constant 0 : i32
    %c0_i32_0 = arith.constant 0 : i32
    %c0_i32_1 = arith.constant 0 : i32
    return %c0_i32, %c0_i32_0 : i32, i32
  }
  func.func @transform_2(%arg0: i32) -> (i32, i32) {
    %c0_i32 = arith.constant 0 : i32
    %c0_i32_0 = arith.constant 0 : i32
    %c0_i32_1 = arith.constant 0 : i32
    return %c0_i32, %c0_i32_0 : i32, i32
  }
  func.func @transform_3(%arg0: i32) -> (i32, i32) {
    %c0_i32 = arith.constant 0 : i32
    %c0_i32_0 = arith.constant 0 : i32
    %c0_i32_1 = arith.constant 0 : i32
    return %c0_i32, %c0_i32_0 : i32, i32
  }
  func.func @transform_4(%arg0: i32) -> (i32, i32) {
    %c0_i32 = arith.constant 0 : i32
    %c0_i32_0 = arith.constant 0 : i32
    %c0_i32_1 = arith.constant 0 : i32
    return %c0_i32, %c0_i32_0 : i32, i32
  }
  func.func @transform_5(%arg0: i32) -> (i32, i32) {
    %c0_i32 = arith.constant 0 : i32
    %c0_i32_0 = arith.constant 0 : i32
    %c0_i32_1 = arith.constant 0 : i32
    return %c0_i32, %c0_i32_0 : i32, i32
  }
  func.func @transform_6(%arg0: i32) -> (i32, i32, i32) {
    %c0_i32 = arith.constant 0 : i32
    %c0_i32_0 = arith.constant 0 : i32
    %c0_i32_1 = arith.constant 0 : i32
    return %arg0, %c0_i32, %c0_i32_0 : i32, i32, i32
  }
  func.func @transform_7(%arg0: i32) -> (i32, i32, i32) {
    %c0_i32 = arith.constant 0 : i32
    %c0_i32_0 = arith.constant 0 : i32
    %c0_i32_1 = arith.constant 0 : i32
    %c0_i32_2 = arith.constant 0 : i32
    return %c0_i32, %c0_i32_0, %c0_i32_1 : i32, i32, i32
  }
}

</mosaic_0001>

<bundles_post_ra>
// kernel: encoder_rnn_forward.1
= control target key start
LH: loop header
LB: loop body
LE: loop exit
PB: predicated region body
PF: predicated region fallthrough
CT: control target
= control target key end

     0   :  { %s1967_s0 = inlined_call_operand.vmem [shape: bf16[8,8,128], index: 0, kind: input, shape index: {}]   ;;  %s1968_s1 = inlined_call_operand.vmem [shape: s32[8,1], index: 1, kind: input, shape index: {}]   ;;  %s1969_s2 = inlined_call_operand.vmem [shape: bf16[128,384], index: 2, kind: input, shape index: {}]   ;;  %s1970_s3 = inlined_call_operand.vmem [shape: f32[1,384], index: 3, kind: input, shape index: {}]   ;;  %s1971_s4 = inlined_call_operand.vmem [shape: bf16[128,384], index: 4, kind: input, shape index: {}]   ;;  %s1972_s5 = inlined_call_operand.vmem [shape: f32[1,128], index: 5, kind: input, shape index: {}]   ;;  %s1973_s6 = inlined_call_operand.hbm [shape: f32[8,8,128], index: 6, kind: output, shape index: {0}]   ;;  %s1974_s7 = inlined_call_operand.hbm [shape: f32[1,8,128], index: 7, kind: output, shape index: {1}]  }
   0x1   :  { %1976 = sst [smem:[#allocation10_spill]] %s1967_s0 }
   0x2   :  { %13 = vsyncpa [#allocation5], 0 }
   0x3   :  { %15 = vsyncpa [#allocation5 + $0x1], 0 }
   0x4   :  { %16 = vsyncpa [#allocation7], 0  ;;  %s1470_s24 = smov 0   ;;  %s1472_s25 = smov 0  }
   0x5   :  { %s1474_s26 = smov 0   ;;  %s1476_s27 = smov 0  }
   0x6 LB: > { %s1491_s28 = sadd.s32 4294967295, %s1423_s27   ;;  %s989_s29 = sadd.s32 4294967294, %s1423_s27   ;;  %s1423_s27 = sphi %s1476_s27, %s1984_s27   ;;  %s1419_s26 = sphi %s1474_s26, %s1983_s26   ;;  %s1415_s25 = sphi %s1472_s25, %s1982_s25   ;;  %s1411_s24 = sphi %s1470_s24, %s1981_s24  }
   0x7   : > { %s1495_s30 = sadd.s32 1, %s1423_s27   ;;  %s160_s8 = sadd.s32 1, %s1419_s26 }
   0x8   : > { %s157_s9 = ssub.s32 %s1423_s27, %s1495_s30  ;;  %p170_p0 = scmp.ne.s32.totalorder %s1419_s26, %s1415_s25 }
   0x9   : > { %p158_p1 = scmp.eq.s32.totalorder %s157_s9, 0  ;;  %p171_p2 = scmp.eq.s32.totalorder %s1491_s28, 3 }
   0xa   : > { %p176_p3 = scmp.ne.s32.totalorder %s1415_s25, %s1411_s24  ;;  %p177_p4 = scmp.eq.s32.totalorder %s989_s29, 3 }
   0xb   : > { %s1506_s10 = scalar_select %p158_p1, %s1419_s26, %s160_s8  }
   0xc   : > { %p1510_p5 = por %p171_p2, %p170_p0  ;;  %p1514_p6 = por %p177_p4, %p176_p3 }
   0xd   : > { %p992_p7 = scmp.ge.s32.totalorder %s1423_s27, 1  ;;  %p240_p8 = scmp.lt.s32.totalorder %s1423_s27, 5 }
   0xf   : > { %p241_p9 = pnand %p992_p7, %p240_p8 }
  0x10   : > { %s1975_s13 = sand.u32 (!%p241_p9), 1, %s1415_s25   ;;  %s1522_s14 = sshll.u32 (!%p241_p9), %s1491_s28, 1 }
  0x11   : > { %244 = sbr.rel (%p241_p9) target bundleno = 470 (0x1d6), region = 44  ;;  %s993_s15 = sshll.u32 (!%p241_p9), %s1975_s13, 4 }
  0x12   : > { %p273_p10 = scmp.lt.s32.totalorder (!%p241_p9), %s1522_s14, 7  ;;  %s1979_s0 = sld [smem:[#allocation10_spill]] (!%p241_p9) }
  0x13   : > { %s1533_s21 = scalar_lea.vmem (!%p241_p9), [#allocation4], %s993_s15  ;;  %p996_p11 = scmp.ne.s32.totalorder (!%p241_p9), %s1491_s28, 0 }
  0x16   : > { %s274_s16 = scalar_select %p273_p10, %s1522_s14, 7 }
  0x17   : > { %282 = sbr.rel (%p996_p11) target bundleno = 30 (0x1e), region = 48 }
  0x18   : > { %s995_s17 = sshll.u32 %s274_s16, 2 }
  0x19   : > { %s1531_s20 = scalar_lea.vmem %s1979_s0, %s995_s17 }
  0x1c   : > { %v1425_v0 = vmov 0.0  }
  0x1d   : > { %283 = vst [vmem:[#allocation3] sm:$0xff] %v1425_v0 }
  0x1e PF: > { %v1087_v1 = vld [vmem:[%s1969_s2 + $0xa8] sm:$0xf]  ;;  %v1230_v2 = vld [vmem:[%s1969_s2 + $0xb0] sm:$0xf0]  ;;  %v1075_v6 = vld [vmem:[%s1969_s2 + $0x90] sm:$0xf] }
  0x1f   : > { %v1184_v3 = vld [vmem:[%s1971_s4 + $0xa8] sm:$0xf]  ;;  %v1088_v4 = vor.u32 %v1230_v2, %v1087_v1  ;;  %v1254_v5 = vld [vmem:[%s1971_s4 + $0xb0] sm:$0xf0]  ;;  %v1227_v7 = vld [vmem:[%s1969_s2 + $0x98] sm:$0xf0] }
  0x20   : > { %v1554_v8 = vor.u32 %v1254_v5, %v1184_v3  ;;  %v1172_v9 = vld [vmem:[%s1971_s4 + $0x90] sm:$0xf]  ;;  %v1251_v10 = vld [vmem:[%s1971_s4 + $0x98] sm:$0xf0]  ;;  %v1229_v11 = vld [vmem:[%s1969_s2 + $0xac] sm:$0xf]  ;;  %v1076_v12 = vor.u32 %v1227_v7, %v1075_v6 }
  0x21   : > { %460 = vmatpush.bf16.msra.mxu0 %v1088_v4  ;;  %v1089_v13 = vld [vmem:[%s1969_s2 + $0xb4] sm:$0xf0]  ;;  %v1569_v14 = vor.u32 %v1251_v10, %v1172_v9  ;;  %v1224_v17 = vld [vmem:[%s1969_s2 + $0x80] sm:$0xf0]  ;;  %v1226_v18 = vld [vmem:[%s1969_s2 + $0x94] sm:$0xf] }
  0x22   : > { %679 = vmatpush.bf16.msra.mxu3 %v1554_v8  ;;  %v1092_v15 = vor.u32 %v1229_v11, %v1089_v13  ;;  %v1063_v16 = vld [vmem:[%s1969_s2 + $0x78] sm:$0xf]  ;;  %v1248_v20 = vld [vmem:[%s1971_s4 + $0x80] sm:$0xf0]  ;;  %v1077_v21 = vld [vmem:[%s1969_s2 + $0x9c] sm:$0xf0] }
  0x23   : > { %v1160_v19 = vld [vmem:[%s1971_s4 + $0x78] sm:$0xf]  ;;  %v1080_v22 = vor.u32 %v1226_v18, %v1077_v21  ;;  %v1064_v23 = vor.u32 %v1224_v17, %v1063_v16  ;;  %v1223_v24 = vld [vmem:[%s1969_s2 + $0x7c] sm:$0xf]  ;;  %v1065_v25 = vld [vmem:[%s1969_s2 + $0x84] sm:$0xf0] }
  0x24   : > { %474 = vmatpush.bf16.msra.mxu1 %v1092_v15  ;;  %v1596_v26 = vor.u32 %v1248_v20, %v1160_v19  ;;  %v1051_v27 = vld [vmem:[%s1969_s2 + $0x60] sm:$0xf]  ;;  %v1221_v28 = vld [vmem:[%s1969_s2 + $0x68] sm:$0xf0]  ;;  %v1068_v31 = vor.u32 %v1223_v24, %v1065_v25  ;;  %v1220_v33 = vld [vmem:[%s1969_s2 + $0x64] sm:$0xf] }
  0x25   : > { %461 = vmatpush.bf16.msra.mxu0 %v1076_v12  ;;  %v1148_v29 = vld [vmem:[%s1971_s4 + $0x60] sm:$0xf]  ;;  %v1245_v30 = vld [vmem:[%s1971_s4 + $0x68] sm:$0xf0]  ;;  %v1052_v32 = vor.u32 %v1221_v28, %v1051_v27  ;;  %v1053_v34 = vld [vmem:[%s1969_s2 + $0x6c] sm:$0xf0] }
  0x26   : > { %680 = vmatpush.bf16.msra.mxu3 %v1569_v14  ;;  %v1617_v35 = vor.u32 %v1245_v30, %v1148_v29  ;;  %v1039_v36 = vld [vmem:[%s1969_s2 + $0x48] sm:$0xf]  ;;  %v1218_v37 = vld [vmem:[%s1969_s2 + $0x50] sm:$0xf0]  ;;  %v1056_v40 = vor.u32 %v1220_v33, %v1053_v34  ;;  %v1027_v42 = vld [vmem:[%s1969_s2 + $0x30] sm:$0xf] }
  0x27   : > { %v1136_v38 = vld [vmem:[%s1971_s4 + $0x48] sm:$0xf]  ;;  %v1242_v39 = vld [vmem:[%s1971_s4 + $0x50] sm:$0xf0]  ;;  %v1040_v41 = vor.u32 %v1218_v37, %v1039_v36  ;;  %v1217_v43 = vld [vmem:[%s1969_s2 + $0x4c] sm:$0xf] }
  0x28   : > { %475 = vmatpush.bf16.msra.mxu1 %v1080_v22  ;;  %v1041_v44 = vld [vmem:[%s1969_s2 + $0x54] sm:$0xf0]  ;;  %v1641_v45 = vor.u32 %v1242_v39, %v1136_v38  ;;  %v1215_v46 = vld [vmem:[%s1969_s2 + $0x38] sm:$0xf0]  ;;  %v1095_v47 = vld [vmem:[%s1969_s2 + $0xb0] sm:$0xf] }
  0x29   : > { %462 = vmatpush.bf16.msra.mxu0 %v1064_v23  ;;  %v1231_v48 = vld [vmem:[%s1969_s2 + $0xb8] sm:$0xf0]  ;;  %v1124_v49 = vld [vmem:[%s1971_s4 + $0x30] sm:$0xf]  ;;  %v1044_v52 = vor.u32 %v1217_v43, %v1041_v44  ;;  %v1083_v53 = vld [vmem:[%s1969_s2 + $0x98] sm:$0xf]  ;;  %v1028_v55 = vor.u32 %v1215_v46, %v1027_v42 }
  0x2a   : > { %681 = vmatpush.bf16.msra.mxu3 %v1596_v26  ;;  %v1239_v50 = vld [vmem:[%s1971_s4 + $0x38] sm:$0xf0]  ;;  %v1096_v51 = vor.u32 %v1231_v48, %v1095_v47  ;;  %v1228_v54 = vld [vmem:[%s1969_s2 + $0xa0] sm:$0xf0]  ;;  %v1214_v56 = vld [vmem:[%s1969_s2 + $0x34] sm:$0xf]  ;;  %v766_v48 = vstv %s1522_s14 }
  0x2b   : > { %v1029_v57 = vld [vmem:[%s1969_s2 + $0x3c] sm:$0xf0]  ;;  %v1084_v58 = vor.u32 %v1228_v54, %v1083_v53  ;;  %v1671_v59 = vor.u32 %v1239_v50, %v1124_v49  ;;  %v1015_v60 = vld [vmem:[%s1969_s2 + $0x18] sm:$0xf]  ;;  %v1212_v61 = vld [vmem:[%s1969_s2 + $0x20] sm:$0xf0] }
  0x2c   : > { %476 = vmatpush.bf16.msra.mxu1 %v1068_v31  ;;  %488 = vmatpush.bf16.msra.mxu2 %v1096_v51  ;;  %v1071_v62 = vld [vmem:[%s1969_s2 + $0x80] sm:$0xf]  ;;  %v1112_v63 = vld [vmem:[%s1971_s4 + $0x18] sm:$0xf]  ;;  %v1236_v0 = vld [vmem:[%s1971_s4 + $0x20] sm:$0xf0]  ;;  %v1032_v2 = vor.u32 %v1214_v56, %v1029_v57  ;;  %v1016_v4 = vor.u32 %v1212_v61, %v1015_v60 }
  0x2d   : > { %463 = vmatpush.bf16.msra.mxu0 %v1052_v32  ;;  %v1225_v1 = vld [vmem:[%s1969_s2 + $0x88] sm:$0xf0]  ;;  %v1003_v3 = vld [vmem:[%s1969_s2] sm:$0xf]  ;;  %v1211_v6 = vld [vmem:[%s1969_s2 + $0x1c] sm:$0xf]  ;;  %v1704_v10 = vor.u32 %v1236_v0, %v1112_v63 }
  0x2e   : > { %682 = vmatpush.bf16.msra.mxu3 %v1617_v35  ;;  %v1209_v5 = vld [vmem:[%s1969_s2 + $0x8] sm:$0xf0]  ;;  %v1017_v7 = vld [vmem:[%s1969_s2 + $0x24] sm:$0xf0]  ;;  %v1072_v9 = vor.u32 %v1225_v1, %v1071_v62  ;;  %v1100_v11 = vld [vmem:[%s1971_s4] sm:$0xf] }
  0x2f   : > { %v1059_v12 = vld [vmem:[%s1969_s2 + $0x68] sm:$0xf]  ;;  %v1222_v13 = vld [vmem:[%s1969_s2 + $0x70] sm:$0xf0]  ;;  %v1233_v15 = vld [vmem:[%s1971_s4 + $0x8] sm:$0xf0]  ;;  %v1020_v18 = vor.u32 %v1211_v6, %v1017_v7  ;;  %v1004_v19 = vor.u32 %v1209_v5, %v1003_v3 }
  0x30   : > { %477 = vmatpush.bf16.msra.mxu1 %v1056_v40  ;;  %489 = vmatpush.bf16.msra.mxu2 %v1084_v58  ;;  %v1253_v16 = vld [vmem:[%s1971_s4 + $0xac] sm:$0xf]  ;;  %v1186_v17 = vld [vmem:[%s1971_s4 + $0xb4] sm:$0xf0]  ;;  %v1724_v20 = vld [vmem:[#allocation3] sm:$0xff]  ;;  %v1060_v23 = vor.u32 %v1222_v13, %v1059_v12  ;;  %v1733_v24 = vor.u32 %v1233_v15, %v1100_v11  ;;  %s868_s19 = sadd.s32 1, %s1522_s14 }
  0x31   : > { %464 = vmatpush.bf16.msra.mxu0 %v1040_v41  ;;  %v1208_v21 = vld [vmem:[%s1969_s2 + $0x4] sm:$0xf]  ;;  %v1005_v22 = vld [vmem:[%s1969_s2 + $0xc] sm:$0xf0]  ;;  %v1189_v25 = vor.u32 %v1253_v16, %v1186_v17  ;;  %v1250_v27 = vld [vmem:[%s1971_s4 + $0x94] sm:$0xf]  ;;  %v1758_v36 = vpack.c.bf16 %v1724_v20, %v1724_v20  ;;  %v869_v61 = vstv %s868_s19 }
  0x32   : > { %683 = vmatpush.bf16.msra.mxu3 %v1641_v45  ;;  %v1192_v28 = vld [vmem:[%s1971_s4 + $0xb0] sm:$0xf]  ;;  %v1255_v29 = vld [vmem:[%s1971_s4 + $0xb8] sm:$0xf0]  ;;  %v1174_v30 = vld [vmem:[%s1971_s4 + $0x9c] sm:$0xf0]  ;;  %v1008_v33 = vor.u32 %v1208_v21, %v1005_v22 }
  0x33   : > { %v1047_v31 = vld [vmem:[%s1969_s2 + $0x50] sm:$0xf]  ;;  %v1219_v32 = vld [vmem:[%s1969_s2 + $0x58] sm:$0xf0]  ;;  %v1754_v34 = vld [vmem:[%s1531_s20] sm:$0xff]  ;;  %v1760_v37 = vor.u32 %v1255_v29, %v1192_v28  ;;  %v1177_v39 = vor.u32 %v1250_v27, %v1174_v30  ;;  %p1199_p12 = scmp.ne.s32.totalorder %s1491_s28, 3 }
  0x34   : > { %478 = vmatpush.bf16.msra.mxu1 %v1044_v52  ;;  %490 = vmatpush.bf16.msra.mxu2 %v1072_v9  ;;  %v1247_v38 = vld [vmem:[%s1971_s4 + $0x7c] sm:$0xf]  ;;  %v1180_v40 = vld [vmem:[%s1971_s4 + $0x98] sm:$0xf]  ;;  %v1252_v41 = vld [vmem:[%s1971_s4 + $0xa0] sm:$0xf0]  ;;  %v1048_v42 = vor.u32 %v1219_v32, %v1047_v31 }
  0x35   : > { %465 = vmatpush.bf16.msra.mxu0 %v1028_v55  ;;  %v1162_v43 = vld [vmem:[%s1971_s4 + $0x84] sm:$0xf0]  ;;  %v1035_v44 = vld [vmem:[%s1969_s2 + $0x38] sm:$0xf]  ;;  %v1216_v46 = vld [vmem:[%s1969_s2 + $0x40] sm:$0xf0]  ;;  %v1789_v49 = vor.u32 %v1252_v41, %v1180_v40 }
  0x36   : > { %684 = vmatpush.bf16.msra.mxu3 %v1671_v59  ;;  %v508_v47 = vld [vmem:[%s1968_s1] sm:$0xff]  ;;  %v1165_v51 = vor.u32 %v1247_v38, %v1162_v43  ;;  %v1249_v53 = vld [vmem:[%s1971_s4 + $0x88] sm:$0xf0]  ;;  %v1036_v54 = vor.u32 %v1216_v46, %v1035_v44  ;;  %v1426_v55 = vmov 0   ;;  %v1150_v57 = vld [vmem:[%s1971_s4 + $0x6c] sm:$0xf0] }
  0x37   : > { %v1244_v50 = vld [vmem:[%s1971_s4 + $0x64] sm:$0xf]  ;;  %vm767_vm0 = vcmp.lt.s32.totalorder %v766_v48, %v508_v47  ;;  %v1168_v52 = vld [vmem:[%s1971_s4 + $0x80] sm:$0xf]  ;;  %v1213_v60 = vld [vmem:[%s1969_s2 + $0x28] sm:$0xf0]  ;;  %1307 = vset.pattern.permute.xlu0 %v1426_v55  ;;  %vm870_vm1 = vcmp.lt.s32.totalorder %v869_v61, %v508_v47 }
  0x38   : > { %479 = vmatpush.bf16.msra.mxu1 %v1032_v2  ;;  %491 = vmatpush.bf16.msra.mxu2 %v1060_v23  ;;  %v768_v56 = vsel %vm767_vm0, 1, %v1426_v55  ;;  %v1023_v58 = vld [vmem:[%s1969_s2 + $0x20] sm:$0xf]  ;;  %v1811_v62 = vor.u32 %v1249_v53, %v1168_v52  ;;  %v1153_v63 = vor.u32 %v1244_v50, %v1150_v57  ;;  %v1241_v0 = vld [vmem:[%s1971_s4 + $0x4c] sm:$0xf]  ;;  %v871_v9 = vsel %vm870_vm1, 1, %v1426_v55 }
  0x39   : > { %466 = vmatpush.bf16.msra.mxu0 %v1016_v4  ;;  %770 = vperm.xlu0 %1307, %v768_v56   ;;  %v1156_v1 = vld [vmem:[%s1971_s4 + $0x68] sm:$0xf]  ;;  %v1246_v2 = vld [vmem:[%s1971_s4 + $0x70] sm:$0xf0]  ;;  %v1024_v3 = vor.u32 %v1213_v60, %v1023_v58  ;;  %v1138_v4 = vld [vmem:[%s1971_s4 + $0x54] sm:$0xf0] }
  0x3a   : > { %685 = vmatpush.bf16.msra.mxu3 %v1704_v10  ;;  %v1011_v5 = vld [vmem:[%s1969_s2 + $0x8] sm:$0xf]  ;;  %v1210_v6 = vld [vmem:[%s1969_s2 + $0x10] sm:$0xf0]  ;;  %v1157_v7 = vor.u32 %v1246_v2, %v1156_v1  ;;  %v1141_v11 = vor.u32 %v1241_v0, %v1138_v4  ;;  %v1144_v12 = vld [vmem:[%s1971_s4 + $0x50] sm:$0xf] }
  0x3b   : > { %v1243_v13 = vld [vmem:[%s1971_s4 + $0x58] sm:$0xf0]  ;;  %v1012_v15 = vor.u32 %v1210_v6, %v1011_v5  ;;  %v1238_v16 = vld [vmem:[%s1971_s4 + $0x34] sm:$0xf]  ;;  %v1126_v17 = vld [vmem:[%s1971_s4 + $0x3c] sm:$0xf0] }
  0x3c   : > { %480 = vmatpush.bf16.msra.mxu1 %v1020_v18  ;;  %492 = vmatpush.bf16.msra.mxu2 %v1048_v42  ;;  %v1145_v18 = vor.u32 %v1243_v13, %v1144_v12  ;;  %v1132_v21 = vld [vmem:[%s1971_s4 + $0x38] sm:$0xf]  ;;  %v1240_v22 = vld [vmem:[%s1971_s4 + $0x40] sm:$0xf0]  ;;  %v1235_v23 = vld [vmem:[%s1971_s4 + $0x1c] sm:$0xf] }
  0x3d   : > { %467 = vmatpush.bf16.msra.mxu0 %v1004_v19  ;;  %v1129_v19 = vor.u32 %v1238_v16, %v1126_v17  ;;  %v1133_v27 = vor.u32 %v1240_v22, %v1132_v21  ;;  %v1120_v29 = vld [vmem:[%s1971_s4 + $0x20] sm:$0xf]  ;;  %v1237_v30 = vld [vmem:[%s1971_s4 + $0x28] sm:$0xf0]  ;;  %v1232_v31 = vld [vmem:[%s1971_s4 + $0x4] sm:$0xf] }
  0x3e   : > { %686 = vmatpush.bf16.msra.mxu3 %v1733_v24  ;;  %v1121_v32 = vor.u32 %v1237_v30, %v1120_v29  ;;  %v1234_v38 = vld [vmem:[%s1971_s4 + $0x10] sm:$0xf0]  ;;  %v1902_v61 = vld [vmem:[%s1972_s5] ss:$0 sm:$0xff] }
  0x40   : > { %481 = vmatpush.bf16.msra.mxu1 %v1008_v33  ;;  %468 = vmatmul.bf16.vlgmr.msra.gmra.mxu0 %v1754_v34 }
  0x41   : > { %692 = vmatpush.bf16.msrb.mxu0 %v1189_v25  ;;  %687 = vmatmul.bf16.vlgmr.msra.gmra.mxu3 %v1758_v36 }
  0x42   : > { %794 = vmatpush.bf16.msrb.mxu3 %v1189_v25  ;;  %493 = vmatpush.bf16.msra.mxu2 %v1036_v54  ;;  %v1114_v25 = vld [vmem:[%s1971_s4 + $0x24] sm:$0xf0] }
  0x43   : > { %482 = vmatmul.bf16.vlgmr.msra.gmra.mxu1 %v1754_v34  ;;  %873 = vperm.xlu0 %1307, %v871_v9   ;;  %v1117_v28 = vor.u32 %v1235_v23, %v1114_v25 }
  0x44   : > { %705 = vmatpush.bf16.msrb.mxu1 %v1760_v37 }
  0x45   : > { %693 = vmatpush.bf16.msrb.mxu0 %v1177_v39 }
  0x46   : > { %795 = vmatpush.bf16.msrb.mxu3 %v1177_v39  ;;  %494 = vmatpush.bf16.msra.mxu2 %v1024_v3 }
  0x48   : > { %706 = vmatpush.bf16.msrb.mxu1 %v1789_v49 }
  0x49   : > { %694 = vmatpush.bf16.msrb.mxu0 %v1165_v51 }
  0x4a   : > { %796 = vmatpush.bf16.msrb.mxu3 %v1165_v51  ;;  %495 = vmatpush.bf16.msra.mxu2 %v1012_v15 }
  0x4c   : > { %707 = vmatpush.bf16.msrb.mxu1 %v1811_v62 }
  0x4d   : > { %695 = vmatpush.bf16.msrb.mxu0 %v1153_v63  ;;  %496 = vmatmul.bf16.vlgmr.msra.gmra.mxu2 %v1754_v34  ;;  %v1108_v34 = vld [vmem:[%s1971_s4 + $0x8] sm:$0xf] }
  0x4e   : > { %797 = vmatpush.bf16.msrb.mxu3 %v1153_v63  ;;  %781 = vmatpush.bf16.msrb.mxu2 %v1554_v8  ;;  %v1102_v8 = vld [vmem:[%s1971_s4 + $0xc] sm:$0xf0]  ;;  %v1109_v39 = vor.u32 %v1234_v38, %v1108_v34 }
  0x4f   : > { %v1105_v33 = vor.u32 %v1232_v31, %v1102_v8 }
  0x50   : > { %708 = vmatpush.bf16.msrb.mxu1 %v1157_v7 }
  0x51   : > { %696 = vmatpush.bf16.msrb.mxu0 %v1141_v11 }
  0x52   : > { %798 = vmatpush.bf16.msrb.mxu3 %v1141_v11  ;;  %782 = vmatpush.bf16.msrb.mxu2 %v1569_v14  ;;  %v1891_v14 = vld [vmem:[%s1970_s3] sm:$0x7] }
  0x53   : > { %v322_v5 = vperm.slane %v1891_v14, 2 }
  0x54   : > { %709 = vmatpush.bf16.msrb.mxu1 %v1145_v18 }
  0x55   : > { %697 = vmatpush.bf16.msrb.mxu0 %v1129_v19 }
  0x56   : > { %799 = vmatpush.bf16.msrb.mxu3 %v1129_v19  ;;  %783 = vmatpush.bf16.msrb.mxu2 %v1596_v26  ;;  %v320_v26 = vperm.slane %v1891_v14, 0 }
  0x58   : > { %710 = vmatpush.bf16.msrb.mxu1 %v1133_v27 }
  0x59   : > { %698 = vmatpush.bf16.msrb.mxu0 %v1117_v28 }
  0x5a   : > { %800 = vmatpush.bf16.msrb.mxu3 %v1117_v28  ;;  %784 = vmatpush.bf16.msrb.mxu2 %v1617_v35 }
  0x5c   : > { %711 = vmatpush.bf16.msrb.mxu1 %v1121_v32 }
  0x5d   : > { %699 = vmatpush.bf16.msrb.mxu0 %v1105_v33 }
  0x5e   : > { %801 = vmatpush.bf16.msrb.mxu3 %v1105_v33  ;;  %785 = vmatpush.bf16.msrb.mxu2 %v1641_v45 }
  0x60   : > { %700 = vmatmul.bf16.vlgmr.msrb.gmra.mxu0 %v1758_v36  ;;  %712 = vmatpush.bf16.msrb.mxu1 %v1109_v39 }
  0x61   : > { %807 = vmatpush.bf16.msra.mxu0 %v1760_v37 }
  0x62   : > { %786 = vmatpush.bf16.msrb.mxu2 %v1671_v59 }
  0x63   : > { %713 = vmatmul.bf16.vlgmr.msrb.gmra.mxu1 %v1758_v36 }
  0x65   : > { %808 = vmatpush.bf16.msra.mxu0 %v1789_v49 }
  0x66   : > { %787 = vmatpush.bf16.msrb.mxu2 %v1704_v10  ;;  %v321_v10 = vperm.slane %v1891_v14, 1 }
  0x69   : > { %809 = vmatpush.bf16.msra.mxu0 %v1811_v62 }
  0x6a   : > { %788 = vmatpush.bf16.msrb.mxu2 %v1733_v24 }
  0x6d   : > { %810 = vmatpush.bf16.msra.mxu0 %v1157_v7 }
  0x71   : > { %811 = vmatpush.bf16.msra.mxu0 %v1145_v18 }
  0x75   : > { %812 = vmatpush.bf16.msra.mxu0 %v1133_v27 }
  0x79   : > { %813 = vmatpush.bf16.msra.mxu0 %v1121_v32 }
  0x7d   : > { %814 = vmatpush.bf16.msra.mxu0 %v1109_v39 }
  0xab   : > { %v771_v29 = vpop.permute.xlu0 %770 }
  0xac   : > { %vm772_vm10 = vcmp.eq.s32.totalorder %v771_v29, 1 }
  0xbd   : > { %v469_v35 = vpop.f32.mrf.mxu0 }
  0xbe   : > { %v470_v36 = vadd.f32 %v469_v35, %v320_v26 }
  0xc0   : > { %v483_v45 = vpop.f32.mrf.mxu1 }
  0xc1   : > { %v484_v48 = vadd.f32 %v483_v45, %v321_v10 }
  0xc4   : > { %v688_v59 = vpop.f32.mrf.mxu3 }
  0xc5   : > { %v718_v37 = vadd.f32 %v688_v59, %v470_v36  ;;  %v471_v40 = vpop.f32.mrf.mxu0 }
  0xc6   : > { %v1895_v41 = vadd.f32 %v471_v40, %v320_v26 }
  0xc7   : > { %v1194_v24 = vmul.f32 -1.442695, %v718_v37 }
  0xc8   : > { %v485_v42 = vpop.f32.mrf.mxu1 }
  0xc9   : > { %1309 = vpow2.f32 %v1194_v24  ;;  %v1897_v43 = vadd.f32 %v485_v42, %v321_v10 }
  0xcc   : > { %v690_v44 = vpop.f32.mrf.mxu3 }
  0xcf   : > { %v1310_v46 = vpop.eup %1309 }
  0xd0   : > { %v722_v47 = vadd.f32 1.0, %v1310_v46  ;;  %v497_v7 = vpop.f32.mrf.mxu2 }
  0xd1   : > { %v498_v11 = vadd.f32 %v497_v7, %v322_v5 }
  0xd2   : > { %1311 = vrcp.f32 %v722_v47  ;;  %vm728_vm2 = vweird.f32 %v722_v47  ;;  %v734_v60 = vand.u32 2147483648, %v722_v47  ;;  %v732_v62 = vand.u32 2147483647, %v722_v47 }
  0xd4   : > { %v735_v3 = vor.u32 1.1754944e-38, %v734_v60  ;;  %vm733_vm5 = vcmp.eq.f32.partialorder %v732_v62, 8.507059e+37 }
  0xd8   : > { %v1312_v49 = vpop.eup %1311  ;;  %v499_v38 = vpop.f32.mrf.mxu2 }
  0xd9   : > { %v724_v50 = vmul.f32 %v1312_v49, %v722_v47  ;;  %vm729_vm3 = vweird.f32 %v1312_v49 }
  0xda   : > { %vm730_vm4 = vmor %vm728_vm2, %vm729_vm3 }
  0xdb   : > { %v725_v53 = vsub.f32 1.0, %v724_v50 }
  0xdd   : > { %v701_v51 = vpop.f32.mrf.mxu0  ;;  %v726_v56 = vmul.f32 %v1312_v49, %v725_v53 }
  0xde   : > { %v738_v52 = vadd.f32 %v701_v51, %v484_v48 }
  0xdf   : > { %v727_v57 = vadd.f32 %v1312_v49, %v726_v56 }
  0xe0   : > { %v1195_v54 = vmul.f32 -1.442695, %v738_v52  ;;  %v714_v55 = vpop.f32.mrf.mxu1 }
  0xe1   : > { %v731_v2 = vsel %vm730_vm4, %v1312_v49, %v727_v57  ;;  %v758_v4 = vadd.f32 %v1902_v61, %v714_v55 }
  0xe2   : > { %1313 = vpow2.f32 %v1195_v54  ;;  %v736_v6 = vsel %vm733_vm5, %v735_v3, %v731_v2 }
  0xe3   : > { %v759_v9 = vmul.f32 %v758_v4, %v736_v6 }
  0xe5   : > { %v703_v58 = vpop.f32.mrf.mxu0  ;;  %v760_v15 = vadd.f32 %v759_v9, %v498_v11  ;;  %v874_v11 = vpop.permute.xlu0 %873 }
  0xe6   : > { %vm875_vm3 = vcmp.eq.s32.totalorder %v874_v11, 1 }
  0xe8   : > { %v1314_v63 = vpop.eup %1313  ;;  %v716_v0 = vpop.f32.mrf.mxu1 }
  0xe9   : > { %v742_v1 = vadd.f32 1.0, %v1314_v63  ;;  %v500_v63 = vadd.f32 %v499_v38, %v322_v5 }
  0xeb   : > { %1315 = vrcp.f32 %v742_v1  ;;  %v754_v17 = vand.u32 2147483648, %v742_v1  ;;  %v752_v19 = vand.u32 2147483647, %v742_v1  ;;  %vm748_vm7 = vweird.f32 %v742_v1 }
  0xec   : > { %1317 = vtanh.f32 %v760_v15 }
  0xed   : > { %v755_v22 = vor.u32 1.1754944e-38, %v754_v17  ;;  %vm753_vm9 = vcmp.eq.f32.partialorder %v752_v19, 8.507059e+37 }
  0xf1   : > { %v1316_v12 = vpop.eup %1315 }
  0xf2   : > { %v744_v13 = vmul.f32 %v1316_v12, %v742_v1  ;;  %vm749_vm6 = vweird.f32 %v1316_v12  ;;  %v1318_v28 = vpop.eup %1317 }
  0xf3   : > { %vm750_vm8 = vmor %vm748_vm7, %vm749_vm6 }
  0xf4   : > { %v745_v16 = vsub.f32 1.0, %v744_v13 }
  0xf6   : > { %v746_v18 = vmul.f32 %v1316_v12, %v745_v16 }
  0xf8   : > { %v747_v21 = vadd.f32 %v1316_v12, %v746_v18 }
  0xfa   : > { %v751_v23 = vsel %vm750_vm8, %v1316_v12, %v747_v21 }
  0xfb   : > { %v756_v25 = vsel %vm753_vm9, %v755_v22, %v751_v23 }
  0xfc   : > { %v762_v27 = vsub.f32 1.0, %v756_v25  ;;  %v764_v31 = vmul.f32 %v756_v25, %v1724_v20 }
  0xfe   : > { %v763_v30 = vmul.f32 %v1318_v28, %v762_v27 }
 0x100   : > { %v765_v8 = vadd.f32 %v764_v31, %v763_v30 }
 0x102   : > { %v773_v32 = vsel %vm772_vm10, %v765_v8, 0.0  ;;  %v1910_v33 = vsel %vm772_vm10, %v765_v8, %v1724_v20 }
 0x103   : > { %774 = vst [vmem:[%s1533_s21] sm:$0xff] %v773_v32  ;;  %v780_v34 = vpack.c.bf16 %v1910_v33, %v1910_v33 }
 0x105   : > { %789 = vmatmul.bf16.vlgmr.msrb.gmra.mxu2 %v780_v34  ;;  %802 = vmatmul.bf16.vlgmr.msrb.gmra.mxu3 %v780_v34 }
 0x106   : > { %815 = vmatmul.bf16.vlgmr.msra.gmra.mxu0 %v780_v34 }
 0x183   : > { %v816_v39 = vpop.f32.mrf.mxu0 }
 0x184   : > { %v860_v57 = vadd.f32 %v1902_v61, %v816_v39 }
 0x188   : > { %v790_v26 = vpop.f32.mrf.mxu2  ;;  %v803_v35 = vpop.f32.mrf.mxu3 }
 0x189   : > { %v820_v45 = vadd.f32 %v790_v26, %v1895_v41  ;;  %v840_v36 = vadd.f32 %v803_v35, %v1897_v43 }
 0x18b   : > { %v1196_v59 = vmul.f32 -1.442695, %v820_v45  ;;  %v1197_v37 = vmul.f32 -1.442695, %v840_v36  ;;  %v818_v40 = vpop.f32.mrf.mxu0 }
 0x18d   : > { %1319 = vpow2.f32 %v1196_v59 }
 0x18e   : > { %1321 = vpow2.f32 %v1197_v37 }
 0x190   : > { %v792_v20 = vpop.f32.mrf.mxu2  ;;  %v805_v10 = vpop.f32.mrf.mxu3 }
 0x193   : > { %v1320_v24 = vpop.eup %1319 }
 0x194   : > { %v1322_v42 = vpop.eup %1321  ;;  %v824_v44 = vadd.f32 1.0, %v1320_v24 }
 0x195   : > { %v844_v46 = vadd.f32 1.0, %v1322_v42 }
 0x196   : > { %1323 = vrcp.f32 %v824_v44  ;;  %v836_v51 = vand.u32 2147483648, %v824_v44  ;;  %v834_v53 = vand.u32 2147483647, %v824_v44  ;;  %vm830_vm12 = vweird.f32 %v824_v44 }
 0x197   : > { %1325 = vrcp.f32 %v844_v46  ;;  %v856_v1 = vand.u32 2147483648, %v844_v46  ;;  %vm850_vm0 = vweird.f32 %v844_v46  ;;  %v854_v2 = vand.u32 2147483647, %v844_v46 }
 0x198   : > { %v837_v56 = vor.u32 1.1754944e-38, %v836_v51  ;;  %vm835_vm14 = vcmp.eq.f32.partialorder %v834_v53, 8.507059e+37 }
 0x199   : > { %v857_v6 = vor.u32 1.1754944e-38, %v856_v1  ;;  %vm855_vm2 = vcmp.eq.f32.partialorder %v854_v2, 8.507059e+37 }
 0x19c   : > { %v1324_v47 = vpop.eup %1323 }
 0x19d   : > { %v1326_v48 = vpop.eup %1325  ;;  %v826_v49 = vmul.f32 %v1324_v47, %v824_v44  ;;  %vm831_vm11 = vweird.f32 %v1324_v47 }
 0x19e   : > { %v846_v50 = vmul.f32 %v1326_v48, %v844_v46  ;;  %vm832_vm13 = vmor %vm830_vm12, %vm831_vm11  ;;  %vm851_vm15 = vweird.f32 %v1326_v48 }
 0x19f   : > { %v827_v41 = vsub.f32 1.0, %v826_v49  ;;  %vm852_vm1 = vmor %vm850_vm0, %vm851_vm15 }
 0x1a0   : > { %v847_v43 = vsub.f32 1.0, %v846_v50 }
 0x1a1   : > { %v828_v52 = vmul.f32 %v1324_v47, %v827_v41 }
 0x1a2   : > { %v848_v54 = vmul.f32 %v1326_v48, %v847_v43 }
 0x1a3   : > { %v829_v55 = vadd.f32 %v1324_v47, %v828_v52 }
 0x1a4   : > { %v849_v62 = vadd.f32 %v1326_v48, %v848_v54 }
 0x1a5   : > { %v833_v58 = vsel %vm832_vm13, %v1324_v47, %v829_v55 }
 0x1a6   : > { %v838_v60 = vsel %vm835_vm14, %v837_v56, %v833_v58  ;;  %v853_v4 = vsel %vm852_vm1, %v1326_v48, %v849_v62 }
 0x1a7   : > { %v861_v0 = vmul.f32 %v860_v57, %v838_v60  ;;  %v858_v61 = vsel %vm855_vm2, %v857_v6, %v853_v4 }
 0x1a8   : > { %v864_v7 = vsub.f32 1.0, %v858_v61  ;;  %v866_v13 = vmul.f32 %v858_v61, %v1910_v33 }
 0x1a9   : > { %v862_v3 = vadd.f32 %v861_v0, %v500_v63 }
 0x1ab   : > { %1327 = vtanh.f32 %v862_v3 }
 0x1b1   : > { %v1328_v9 = vpop.eup %1327 }
 0x1b2   : > { %v865_v12 = vmul.f32 %v1328_v9, %v864_v7 }
 0x1b4   : > { %v867_v14 = vadd.f32 %v866_v13, %v865_v12  ;;  %884 = sbr.rel (%p1199_p12) target bundleno = 449 (0x1c1), region = 52 }
 0x1b6   : > { %v876_v5 = vsel %vm875_vm3, %v867_v14, 0.0  ;;  %v879_v15 = vsel %vm875_vm3, %v867_v14, %v1910_v33 }
 0x1b7   : > { %1198 = vst [vmem:[%s1533_s21 + $0x8] sm:$0xff] %v876_v5 }
 0x1b8   : > { %880 = vst [vmem:[#allocation3] sm:$0xff] %v879_v15 }
 0x1bf   : > { %v885_v16 = vld [vmem:[#allocation3] sm:$0xff] }
 0x1c0   : > { %886 = vst [vmem:[#allocation6] sm:$0xff] %v885_v16 }
 0x1c1 PF: > { %s1256_s22 = sshll.u32 %s1491_s28, 4  ;;  %s900_s19 = sshll.u32 %s1533_s21, 4  ;;  %s901_s19 = int_to_ptr.vmem [resolvable:$true] %s900_s19 }
 0x1c2   : > { %s899_s8 = scalar_lea.hbm %s1973_s6, %s1256_s22  ;;  %s1980_s14 = sand.u32 1, %s1415_s25  }
 0x1c3   : > { %s902_s0 = sshll.u32 %s899_s8, 4  ;;  %s888_s9 = scalar_lea.sflag [#allocation5], %s1980_s14  ;;  %s903_s0 = int_to_ptr.hbm [resolvable:$true] %s902_s0 }
 0x1c4   : > { %s1343_s16 = sshra.s32 %s903_s0, 4  ;;  %s1349_s13 = scalar_lea.hbm %s1973_s6, 64  ;;  %s1344_s16 = int_to_ptr.hbm [resolvable:$true] %s1343_s16 }
 0x1c5   : > { %s1345_s15 = scalar_lea.hbm %s1344_s16, 16  ;;  %p1350_p3 = scmp.lt.s32.totalorder %s1344_s16, %s1973_s6 }
 0x1c6   : > { %p1346_p13 = scmp.ne.s32.totalorder %s1344_s16, %s1345_s15  ;;  %p1351_p4 = scmp.lt.s32.totalorder %s1349_s13, %s1345_s15 }
 0x1c8   : > { %p1347_p0 = pnand %p1346_p13, %p1510_p5  ;;  %p1352_p7 = por %p1351_p4, %p1350_p3 }
 0x1ca   : > { %p1348_p1 = pneg %p1347_p0 }
 0x1cc   : > { %p1353_p8 = pnand %p1352_p7, %p1348_p1 }
 0x1ce   : > { %1356 = shalt.err (!%p1353_p8)
}
 0x1cf   : > { %s1427_s21 = smov 128   ;;  %s1428_s22 = smov 8  }
 0x1d0   : > { %1257 = dma.vmem_to_hbm [thread:$0]  (%p1510_p5), %s901_s19, 256, %s903_s0, %s888_s9, %s1427_s21, %s1427_s21, %s1428_s22  }
 0x1d1   : > { %s1429_s29 = smov [#allocation6]   ;;  %s917_s18 = sshll.u32 %s1974_s7, 4  ;;  %s918_s18 = int_to_ptr.hbm [resolvable:$true] %s917_s18 }
 0x1d2   : > { %s915_s8 = sshll.u32 %s1429_s29, 4  ;;  %s916_s8 = int_to_ptr.vmem [resolvable:$true] %s915_s8 }
 0x1d3   : > { %1259 = dma.vmem_to_hbm [thread:$0]  (%p171_p2), %s916_s8, 128, %s918_s18, [#allocation7]  }
 0x1d4   : > { %1402 = dma.done.wait (%p171_p2), [#allocation7], 128  }
 0x1d5   : > { %1404 = vsyncadd (%p171_p2), [#allocation7], 4294967168 }
 0x1d6 PF: > { %p1269_p5 = scmp.ge.s32.totalorder %s1423_s27, 2  ;;  %s934_s11 = sand.u32 1, %s1411_s24  }
 0x1d7   : > { %s935_s19 = scalar_lea.sflag [#allocation5], %s934_s11 }
 0x1d8   : > { %p1264_p9 = pnand %p1269_p5, %p1514_p6 }
 0x1da   : > { %p1265_p10 = pneg %p1264_p9 }
 0x1dc   : > { %1406 = dma.done.wait (%p1265_p10), %s935_s19, 256  }
 0x1dd   : > { %1408 = vsyncadd (%p1265_p10), %s935_s19, 4294967040  ;;  %p19_p11 = scmp.ge.s32.totalorder %s1495_s30, 6   ;;  %s1981_s24 = smov %s1415_s25 }
 0x1de   : > { %s1982_s25 = smov %s1419_s26  ;;  %s1983_s26 = smov %s1506_s10 }
 0x1df   : > { %s1984_s27 = smov %s1495_s30  ;;  %21 = sbr.rel (!%p19_p11) target bundleno = 6 (0x6), region = 97 }
 0x1e4   :  { %941 = vsyncpa [#allocation5], 1 }
 0x1e5   :  { %943 = vsyncpa [#allocation5 + $0x1], 1 }
 0x1e6   :  { %944 = vsyncpa [#allocation7], 1 }

</bundles_post_ra>
